<compile_context>
chip_gen: v5e
topology: v5e:2x2
jax: 0.10.0
libtpu: 0.0.40
codegen_flags: <defaults>
</compile_context>

<pallas_src>
import jax
import jax.numpy as jnp
from jax.experimental import pallas as pl
from jax.experimental.pallas import tpu as pltpu


def _copy_kernel(x_ref, o_ref):
    # Straight tile copy: one vld / one vst per vreg, no VALU/XLU/EUP work.
    o_ref[...] = x_ref[...]


# Keep each tile <= 4 MiB: with double-buffered input + output (4 live
# buffers) this stays well inside v7x's 32 MiB scoped-VMEM default and is
# comfortably large enough to hit HBM roofline on v5e/v6e/v7x.
_MAX_BLOCK_BYTES = 4 * 1024 * 1024


def identity(x: jax.Array) -> jax.Array:
    """nn.Identity: pure pass-through. No kernel, no dispatch, zero bytes."""
    return x


def identity_pallas(x: jax.Array) -> jax.Array:
    """Explicit Pallas materialization of Identity (HBM-roofline tiled copy).

    Use this only when a real buffer boundary is required; otherwise prefer
    identity(), which is free.
    """
    if x.size == 0:
        return x

    orig_shape = x.shape
    total = x.size

    # Present a lane-dense 2D view to the kernel (free metadata reshape on a
    # contiguous array).  Prefer a wide, 128-multiple last dim so stores are
    # unmasked full-rate vst; otherwise fall back to the array's own last dim
    # (block == full dim is always legal).
    x2 = None
    for width in (1024, 512, 256, 128):
        if total % width == 0:
            x2 = x.reshape(-1, width)
            break
    if x2 is None:
        x2 = x.reshape(-1, x.shape[-1]) if x.ndim >= 2 else x.reshape(1, -1)

    rows, cols = x2.shape
    bytes_per_row = cols * x2.dtype.itemsize
    block_rows = max(1, min(rows, _MAX_BLOCK_BYTES // max(1, bytes_per_row)))
    if block_rows < rows:
        # Partial tiling: keep the sublane dim a multiple of 8.
        block_rows = max(8, (block_rows // 8) * 8)
    grid = (pl.cdiv(rows, block_rows),)

    nbytes = total * x.dtype.itemsize
    out2 = pl.pallas_call(
        _copy_kernel,
        out_shape=jax.ShapeDtypeStruct(x2.shape, x2.dtype),
        grid=grid,
        in_specs=[pl.BlockSpec((block_rows, cols), lambda i: (i, 0))],
        out_specs=pl.BlockSpec((block_rows, cols), lambda i: (i, 0)),
        # Tell the scheduler exactly what this costs: no compute, 2x bytes.
        cost_estimate=pl.CostEstimate(
            flops=0, transcendentals=0, bytes_accessed=2 * nbytes),
        # "parallel" lets v7x shard the (purely mem-bound) copy across both
        # TensorCores; harmless on single-TC v5e/v6e.
        compiler_params=pltpu.CompilerParams(
            dimension_semantics=("parallel",)),
    )(x2)
    return out2.reshape(orig_shape)


if __name__ == "__main__":
    key = jax.random.PRNGKey(0)
    # Small NCHW input consistent with a resnet-style feature map.
    x = jax.random.normal(key, (2, 4, 16, 16), dtype=jnp.float32)

    # Zero-cost module-semantics path (no kernel dispatched).
    y_fast = identity(x)
    assert y_fast.shape == x.shape and y_fast.dtype == x.dtype

    # Explicit Pallas path: run the kernel once and verify.
    y = identity_pallas(x)
    y = jax.block_until_ready(y)

    assert y.shape == x.shape, (y.shape, x.shape)
    assert y.dtype == x.dtype, (y.dtype, x.dtype)
    assert bool(jnp.all(y == x)), "identity output mismatch"
    assert bool(jnp.all(y_fast == x)), "identity fast-path mismatch"

    print("KERNEL_OK")
</pallas_src>

<mosaic_0001>
module attributes {stable_mosaic.version = 11 : i64} {
  func.func @_copy_kernel(%arg0: i32, %arg1: memref<2x1024xf32, #tpu.memory_space<vmem>>, %arg2: memref<2x1024xf32, #tpu.memory_space<vmem>>) attributes {dimension_semantics = [#tpu.dimension_semantics<parallel>], iteration_bounds = array<i64: 1>, scalar_prefetch = 0 : i64, scratch_operands = 0 : i64, tpu.core_type = #tpu.core_type<tc>, window_params = [{transform_indices = @transform_0, window_bounds = array<i64: 2, 1024>}, {transform_indices = @transform_1, window_bounds = array<i64: 2, 1024>}]} {
    %c0 = arith.constant 0 : index
    %c0_0 = arith.constant 0 : index
    %0 = vector.load %arg1[%c0, %c0_0] : memref<2x1024xf32, #tpu.memory_space<vmem>>, vector<2x1024xf32>
    %c0_1 = arith.constant 0 : index
    %c0_2 = arith.constant 0 : index
    %1 = vector.load %arg2[%c0_1, %c0_2] : memref<2x1024xf32, #tpu.memory_space<vmem>>, vector<2x1024xf32>
    tpu.vector_store %arg2[%c0_1, %c0_2], %0 {strides = array<i32>} : memref<2x1024xf32, #tpu.memory_space<vmem>>, vector<2x1024xf32>,
    return
  }
  func.func @transform_0(%arg0: i32) -> (i32, i32) {
    %c0_i32 = arith.constant 0 : i32
    %c0_i32_0 = arith.constant 0 : i32
    return %arg0, %c0_i32 : i32, i32
  }
  func.func @transform_1(%arg0: i32) -> (i32, i32) {
    %c0_i32 = arith.constant 0 : i32
    %c0_i32_0 = arith.constant 0 : i32
    return %arg0, %c0_i32 : i32, i32
  }
}

</mosaic_0001>

<bundles_post_ra>
// kernel: tpu_custom_call.1
= control target key start
LH: loop header
LB: loop body
LE: loop exit
PB: predicated region body
PF: predicated region fallthrough
CT: control target
= control target key end

     0   :  { %6 = vsyncpa [#allocation3], 0  ;;  %s116_s0 = inlined_call_operand.hbm [shape: f32[2,1024], index: 0, kind: input, shape index: {}]   ;;  %s117_s1 = inlined_call_operand.hbm [shape: f32[2,1024], index: 1, kind: output, shape index: {}]  }
   0x1   :  { %7 = vsyncpa [#allocation4], 0  ;;  %s13_s8 = sshll.u32 %s116_s0, 4  ;;  %s98_s9 = smov [#allocation2]   ;;  %s14_s8 = int_to_ptr.hbm [resolvable:$true] %s13_s8 }
   0x2   :  { %s15_s10 = sshll.u32 %s98_s9, 4  ;;  %s16_s10 = int_to_ptr.vmem [resolvable:$true] %s15_s10 }
   0x3   :  { %18 = dma.hbm_to_vmem [thread:$0]  %s14_s8, 256, %s16_s10, [#allocation3]  }
   0x4   :  { %94 = dma.done.wait [#allocation3], 256  }
   0x5   :  { %95 = vsyncadd [#allocation3], 4294967040  ;;  %s99_s11 = smov [#allocation5]   ;;  %s34_s15 = sshll.u32 %s117_s1, 4  ;;  %v23_v0 = vld [vmem:[#allocation2] sm:$0xff]  ;;  %v24_v1 = vld [vmem:[#allocation2 + $0x8] sm:$0xff]  ;;  %s35_s15 = int_to_ptr.hbm [resolvable:$true] %s34_s15 }
   0x6   :  { %s32_s12 = sshll.u32 %s99_s11, 4  ;;  %25 = vst [vmem:[#allocation5] sm:$0xff] %v23_v0  ;;  %s33_s12 = int_to_ptr.vmem [resolvable:$true] %s32_s12 }
   0x7   :  { %26 = vst [vmem:[#allocation5 + $0x8] sm:$0xff] %v24_v1 }
   0x8   :  { %37 = dma.vmem_to_hbm [thread:$0]  %s33_s12, 256, %s35_s15, [#allocation4]  }
   0x9   :  { %96 = dma.done.wait [#allocation4], 256  }
   0xa   :  { %97 = vsyncadd [#allocation4], 4294967040 }
   0xb   :  { %42 = vsyncpa [#allocation3], 1 }
   0xc   :  { %43 = vsyncpa [#allocation4], 1 }

</bundles_post_ra>
